<compile_context>
chip_gen: v7x
topology: tpu7x:2x2x1
jax: 0.10.0
libtpu: 0.0.40
codegen_flags: <defaults>
</compile_context>

<pallas_src>
import functools

import jax
import jax.numpy as jnp
from jax.experimental import pallas as pl
from jax.experimental.pallas import tpu as pltpu

_LANES = 128
_TM_MAX = 2048  # 2 inputs x 2 buffers x 2048x128x4B = 4 MiB -> fits everywhere


def _wloss_kernel(yt_ref, yp_ref, out_ref, acc_ref, *, m_rows, total_n, needs_mask):
    """Accumulate sum(yTrue * yPred) across grid steps; finalize mean at the end.

    yt_ref, yp_ref : (TM, 128) VMEM tiles (native dtype, cast to f32 in-kernel)
    out_ref        : (1, 1) SMEM scalar output (the mean)
    acc_ref        : (TM, 128) f32 VMEM accumulator (VPU-only hot loop)
    """
    step = pl.program_id(0)

    @pl.when(step == 0)
    def _():
        acc_ref[...] = jnp.zeros_like(acc_ref)

    prod = yt_ref[...].astype(jnp.float32) * yp_ref[...].astype(jnp.float32)

    if needs_mask:
        # Last block may overrun the array: zero out rows past the true extent.
        tm = prod.shape[0]
        row_ids = jax.lax.broadcasted_iota(jnp.int32, prod.shape, 0)
        valid = (step * tm + row_ids) < m_rows
        prod = jnp.where(valid, prod, jnp.float32(0.0))

    acc_ref[...] += prod

    @pl.when(step == pl.num_programs(0) - 1)
    def _():
        # Single XLU reduce + divide, only in the epilogue.
        out_ref[0, 0] = jnp.sum(acc_ref[...]) / jnp.float32(total_n)


def _sublane_multiple(dtype) -> int:
    return {4: 8, 2: 16, 1: 32}.get(jnp.dtype(dtype).itemsize, 8)


def wasserstein_loss(y_true: jax.Array, y_pred: jax.Array) -> jax.Array:
    """Pallas equivalent of torch.mean(yTrue * yPred). Returns a scalar f32."""
    assert y_true.shape == y_pred.shape, "yTrue / yPred must have same shape"
    total_n = y_true.size

    # Keep native dtypes (e.g. bf16) so the DMA streams the minimum bytes.
    flat_t = y_true.reshape(-1)
    flat_p = y_pred.reshape(-1)

    # Only pad when the total size is not a multiple of 128 lanes (rare for NN
    # tensors); padded zeros do not perturb the sum.
    pad = (-total_n) % _LANES
    if pad:
        flat_t = jnp.pad(flat_t, (0, pad))
        flat_p = jnp.pad(flat_p, (0, pad))
    m = flat_t.size // _LANES
    yt2d = flat_t.reshape(m, _LANES)
    yp2d = flat_p.reshape(m, _LANES)

    # Row tile: big for HBM-roofline amortization, rounded to the sublane
    # packing of the widest-requirement input dtype.  No row padding of the
    # arrays -- the tail block is masked inside the kernel.
    sub = max(_sublane_multiple(y_true.dtype), _sublane_multiple(y_pred.dtype))
    tm = min(_TM_MAX, ((m + sub - 1) // sub) * sub)
    grid = (pl.cdiv(m, tm),)
    needs_mask = (m % tm) != 0

    kernel = functools.partial(
        _wloss_kernel, m_rows=m, total_n=total_n, needs_mask=needs_mask
    )

    bytes_accessed = total_n * (
        jnp.dtype(y_true.dtype).itemsize + jnp.dtype(y_pred.dtype).itemsize
    ) + 4

    out = pl.pallas_call(
        kernel,
        out_shape=jax.ShapeDtypeStruct((1, 1), jnp.float32),
        grid_spec=pltpu.PrefetchScalarGridSpec(
            num_scalar_prefetch=0,
            grid=grid,
            in_specs=[
                pl.BlockSpec((tm, _LANES), lambda i: (i, 0)),
                pl.BlockSpec((tm, _LANES), lambda i: (i, 0)),
            ],
            out_specs=pl.BlockSpec(
                (1, 1), lambda i: (0, 0), memory_space=pltpu.SMEM
            ),
            scratch_shapes=[pltpu.VMEM((tm, _LANES), jnp.float32)],
        ),
        compiler_params=pltpu.CompilerParams(
            dimension_semantics=("arbitrary",)  # sequential reduction axis
        ),
        cost_estimate=pl.CostEstimate(
            flops=2 * total_n, transcendentals=0, bytes_accessed=bytes_accessed
        ),
    )(yt2d, yp2d)

    return out[0, 0]


if __name__ == "__main__":
    key = jax.random.PRNGKey(0)
    _, k2, k3, k4 = jax.random.split(key, 4)

    # Main example: WGAN-style labels (+/-1) against a prediction map.
    batch, ch, h, w = 2, 4, 16, 16
    labels = jnp.where(jnp.arange(batch) % 2 == 0, 1.0, -1.0).astype(jnp.float32)
    y_true = jnp.broadcast_to(labels[:, None, None, None], (batch, ch, h, w))
    y_pred = jax.random.normal(k2, (batch, ch, h, w), dtype=jnp.float32)

    loss = wasserstein_loss(y_true, y_pred)
    jax.block_until_ready(loss)
    ref = jnp.mean(y_true * y_pred)
    assert jnp.allclose(loss, ref, atol=1e-5, rtol=1e-5), (loss, ref)

    # Odd-shaped check: exercises the lane-pad fallback and the in-kernel
    # row-tail mask path.
    a = jax.random.normal(k3, (3, 5, 7), dtype=jnp.float32)
    b = jax.random.normal(k4, (3, 5, 7), dtype=jnp.float32)
    loss2 = wasserstein_loss(a, b)
    jax.block_until_ready(loss2)
    ref2 = jnp.mean(a * b)
    assert jnp.allclose(loss2, ref2, atol=1e-5, rtol=1e-5), (loss2, ref2)

    print("KERNEL_OK")
</pallas_src>

<mosaic_0001>
module attributes {stable_mosaic.version = 11 : i64} {
  func.func @_wloss_kernel(%arg0: i32, %arg1: memref<16x128xf32, #tpu.memory_space<vmem>>, %arg2: memref<16x128xf32, #tpu.memory_space<vmem>>, %arg3: memref<1x1xf32, #tpu.memory_space<smem>>, %arg4: memref<16x128xf32, #tpu.memory_space<vmem>>) attributes {dimension_semantics = [#tpu.dimension_semantics<arbitrary>], iteration_bounds = array<i64: 1>, scalar_prefetch = 0 : i64, scratch_operands = 1 : i64, tpu.core_type = #tpu.core_type<tc>, window_params = [{transform_indices = @transform_0, window_bounds = array<i64: 16, 128>}, {transform_indices = @transform_1, window_bounds = array<i64: 16, 128>}, {transform_indices = @transform_2, window_bounds = array<i64: 1, 1>}]} {
    %c0_i32 = arith.constant 0 : i32
    %0 = arith.cmpi eq, %arg0, %c0_i32 : i32
    %1 = arith.extui %0 : i1 to i32
    %c0_i32_0 = arith.constant 0 : i32
    %2 = arith.cmpi ne, %1, %c0_i32_0 : i32
    scf.if %2 {
      %cst = arith.constant 0.000000e+00 : f32
      %12 = vector.broadcast %cst : f32 to vector<16x128xf32>
      %c0_10 = arith.constant 0 : index
      %c0_11 = arith.constant 0 : index
      %13 = vector.load %arg4[%c0_10, %c0_11] : memref<16x128xf32, #tpu.memory_space<vmem>>, vector<16x128xf32>
      tpu.vector_store %arg4[%c0_10, %c0_11], %12 {strides = array<i32>} : memref<16x128xf32, #tpu.memory_space<vmem>>, vector<16x128xf32>,
    } else {
    }
    %c0 = arith.constant 0 : index
    %c0_1 = arith.constant 0 : index
    %3 = vector.load %arg1[%c0, %c0_1] : memref<16x128xf32, #tpu.memory_space<vmem>>, vector<16x128xf32>
    %c0_2 = arith.constant 0 : index
    %c0_3 = arith.constant 0 : index
    %4 = vector.load %arg2[%c0_2, %c0_3] : memref<16x128xf32, #tpu.memory_space<vmem>>, vector<16x128xf32>
    %5 = arith.mulf %3, %4 : vector<16x128xf32>
    %c0_4 = arith.constant 0 : index
    %c0_5 = arith.constant 0 : index
    %6 = vector.load %arg4[%c0_4, %c0_5] : memref<16x128xf32, #tpu.memory_space<vmem>>, vector<16x128xf32>
    %7 = arith.addf %6, %5 : vector<16x128xf32>
    %c0_6 = arith.constant 0 : index
    %c0_7 = arith.constant 0 : index
    %8 = vector.load %arg4[%c0_6, %c0_7] : memref<16x128xf32, #tpu.memory_space<vmem>>, vector<16x128xf32>
    tpu.vector_store %arg4[%c0_6, %c0_7], %7 {strides = array<i32>} : memref<16x128xf32, #tpu.memory_space<vmem>>, vector<16x128xf32>,
    %c0_i32_8 = arith.constant 0 : i32
    %9 = arith.cmpi eq, %arg0, %c0_i32_8 : i32
    %10 = arith.extui %9 : i1 to i32
    %c0_i32_9 = arith.constant 0 : i32
    %11 = arith.cmpi ne, %10, %c0_i32_9 : i32
    scf.if %11 {
      %c0_10 = arith.constant 0 : index
      %c0_11 = arith.constant 0 : index
      %12 = vector.load %arg4[%c0_10, %c0_11] : memref<16x128xf32, #tpu.memory_space<vmem>>, vector<16x128xf32>
      %13 = vector.shape_cast %12 : vector<16x128xf32> to vector<1x16x128xf32>
      %cst = arith.constant dense<0.000000e+00> : vector<1xf32>
      %14 = vector.multi_reduction <add>, %13, %cst [1, 2] : vector<1x16x128xf32> to vector<1xf32>
      %15 = vector.shape_cast %14 : vector<1xf32> to vector<1x1x1xf32>
      %16 = vector.extract %15[0, 0, 0] : f32 from vector<1x1x1xf32>
      %cst_12 = arith.constant 2.048000e+03 : f32
      %17 = arith.divf %16, %cst_12 : f32
      %c0_13 = arith.constant 0 : index
      %c0_14 = arith.constant 0 : index
      %18 = memref.load %arg3[%c0_13, %c0_14] : memref<1x1xf32, #tpu.memory_space<smem>>
      memref.store %17, %arg3[%c0_13, %c0_14] : memref<1x1xf32, #tpu.memory_space<smem>>
    } else {
    }
    return
  }
  func.func @transform_0(%arg0: i32) -> (i32, i32) {
    %c0_i32 = arith.constant 0 : i32
    %c0_i32_0 = arith.constant 0 : i32
    return %arg0, %c0_i32 : i32, i32
  }
  func.func @transform_1(%arg0: i32) -> (i32, i32) {
    %c0_i32 = arith.constant 0 : i32
    %c0_i32_0 = arith.constant 0 : i32
    return %arg0, %c0_i32 : i32, i32
  }
  func.func @transform_2(%arg0: i32) -> (i32, i32) {
    %c0_i32 = arith.constant 0 : i32
    %c0_i32_0 = arith.constant 0 : i32
    %c0_i32_1 = arith.constant 0 : i32
    return %c0_i32, %c0_i32_0 : i32, i32
  }
}

</mosaic_0001>

<bundles_post_ra>
// kernel: tpu_custom_call.1
= control target key start
LH: loop header
LB: loop body
LE: loop exit
PB: predicated region body
PF: predicated region fallthrough
CT: control target
= control target key end

     0   :  { %7 = vsyncpa [#allocation4], 0  ;;  %s216_s0 = inlined_call_operand.hbm [shape: f32[16,128], index: 0, kind: input, shape index: {}]   ;;  %s217_s1 = inlined_call_operand.hbm [shape: f32[16,128], index: 1, kind: input, shape index: {}]   ;;  %s218_s2 = inlined_call_operand.hbm [shape: f32[1,1], index: 2, kind: output, shape index: {}]  }
   0x1   :  { %8 = vsyncpa [#allocation7], 0 }
   0x2   :  { %9 = vsyncpa [#allocation5], 0  ;;  %s160_s9 = smov [#allocation3]   ;;  %s100_s13 = scalar_lea.hbm %s216_s0, 256 }
   0x3   :  { %s15_s10 = sshll.u32 %s160_s9, 4  ;;  %p101_p0 = scmp.ne.s32.totalorder %s216_s0, %s100_s13  ;;  %s16_s10 = int_to_ptr.vmem [resolvable:$true] %s15_s10 }
   0x4   :  { %p104_p1 = scmp.lt.u32.totalorder %s100_s13, %s216_s0 }
   0x6   :  { %p106_p2 = pnand %p104_p1, %p101_p0 }
   0x8   :  { %109 = shalt.err (!%p106_p2)
}
   0x9   :  { %s110_s18 = scalar_lea.vmem %s16_s10, 256  ;;  %p115_p4 = scmp.lt.s32.totalorder %s16_s10, %s16_s10 }
   0xa   :  { %p111_p3 = scmp.ne.s32.totalorder %s16_s10, %s110_s18  ;;  %p116_p5 = scmp.lt.s32.totalorder %s110_s18, %s110_s18 }
   0xc   :  { %p117_p6 = por %p116_p5, %p115_p4 }
   0xe   :  { %p118_p7 = pnand %p117_p6, %p111_p3 }
  0x10   :  { %121 = shalt.err (!%p118_p7)
}
  0x11   :  { %s161_s19 = smov 128   ;;  %s162_s20 = smov 8  }
  0x12   :  { %21 = dma.hbm_to_vmem [thread:$0]  %s216_s0, 256, %s16_s10, [#allocation4], %s161_s19, %s161_s19, %s162_s20  }
  0x13   :  { %s163_s23 = smov [#allocation6]   ;;  %s122_s27 = scalar_lea.hbm %s217_s1, 256 }
  0x14   :  { %s27_s24 = sshll.u32 %s163_s23, 4  ;;  %p123_p8 = scmp.ne.s32.totalorder %s217_s1, %s122_s27  ;;  %s28_s24 = int_to_ptr.vmem [resolvable:$true] %s27_s24 }
  0x15   :  { %p126_p9 = scmp.lt.u32.totalorder %s122_s27, %s217_s1 }
  0x17   :  { %p128_p10 = pnand %p126_p9, %p123_p8 }
  0x19   :  { %131 = shalt.err (!%p128_p10)
}
  0x1a   :  { %s132_s4 = scalar_lea.vmem %s28_s24, 256  ;;  %p137_p12 = scmp.lt.s32.totalorder %s28_s24, %s28_s24 }
  0x1b   :  { %p133_p11 = scmp.ne.s32.totalorder %s28_s24, %s132_s4  ;;  %p138_p13 = scmp.lt.s32.totalorder %s132_s4, %s132_s4 }
  0x1d   :  { %p139_p0 = por %p138_p13, %p137_p12 }
  0x1f   :  { %p140_p1 = pnand %p139_p0, %p133_p11 }
  0x21   :  { %143 = shalt.err (!%p140_p1)
}
  0x22   :  { %33 = dma.hbm_to_vmem [thread:$0]  %s217_s1, 256, %s28_s24, [#allocation7], %s161_s19, %s161_s19, %s162_s20  }
  0x23   :  { %154 = dma.done.wait [#allocation4], 256  }
  0x24   :  { %155 = vsyncadd [#allocation4], 4294967040 }
  0x25   :  { %156 = dma.done.wait [#allocation7], 256  }
  0x26   :  { %157 = vsyncadd [#allocation7], 4294967040  ;;  %v46_v0 = vld [vmem:[#allocation3] sm:$0xff]  ;;  %v47_v1 = vld [vmem:[#allocation3 + $0x8] sm:$0xff]  ;;  %s144_s9 = scalar_lea.hbm %s218_s2, 16 }
  0x27   :  { %v48_v2 = vld [vmem:[#allocation6] sm:$0xff]  ;;  %v49_v3 = vld [vmem:[#allocation6 + $0x8] sm:$0xff]  ;;  %p145_p2 = scmp.ne.s32.totalorder %s218_s2, %s144_s9  ;;  %p148_p3 = scmp.lt.u32.totalorder %s144_s9, %s218_s2 }
  0x28   :  { %v50_v4 = vmul.f32 %v48_v2, %v46_v0  ;;  %v51_v5 = vmul.f32 %v49_v3, %v47_v1 }
  0x29   :  { %p150_p4 = pnand %p148_p3, %p145_p2 }
  0x2a   :  { %v63_v6 = vadd.f32 %v51_v5, %v50_v4 }
  0x2c   :  { %64 = vadd.xlane.f32.xlu0 %v63_v6 }
  0xb9   :  { %v65_v7 = vpop.xlane.xlu0 %64 }
  0xba   :  { %v66_v8 = vrot.slane %v65_v7, 4 }
  0xbc   :  { %v67_v9 = vadd.f32 %v66_v8, %v65_v7 }
  0xbe   :  { %v68_v10 = vrot.slane %v67_v9, 2 }
  0xc0   :  { %v69_v11 = vadd.f32 %v68_v10, %v67_v9 }
  0xc2   :  { %v70_v12 = vrot.slane %v69_v11, 1 }
  0xc4   :  { %v71_v13 = vadd.f32 %v70_v12, %v69_v11 }
  0xc6   :  { %93 = vpush %v71_v13 }
  0xf7   :  { %s94_s1 = spop %93 }
  0xf8   :  { %s75_s6 = smul.f32 0.00048828125, %s94_s1 }
  0xfa   :  { %77 = sst [smem:[#allocation8]] %s75_s6 }
  0xfb   :  { %153 = shalt.err (!%p150_p4)
}
  0xfc   :  { %s164_s14 = smov [#allocation8]  }
  0xfd   :  { %85 = dma.smem_to_hbm %s164_s14, 16, %s218_s2, [#allocation5]  }
  0xfe   :  { %158 = dma.done.wait [#allocation5], 16  }
  0xff   :  { %159 = vsyncadd [#allocation5], 4294967280 }
 0x100   :  { %89 = sfence }
 0x101   :  { %90 = vsyncpa [#allocation4], 1 }
 0x102   :  { %91 = vsyncpa [#allocation7], 1 }
 0x103   :  { %92 = vsyncpa [#allocation5], 1 }

</bundles_post_ra>
